<compile_context>
chip_gen: v5e
topology: v5e:2x2
jax: 0.10.0
libtpu: 0.0.40
codegen_flags: <defaults>
</compile_context>

<pallas_src>
import functools

import jax
import jax.numpy as jnp
from jax.experimental import pallas as pl
from jax.experimental.pallas import tpu as pltpu


def _round_up(v, m):
    return (v + m - 1) // m * m


def _sobelxy_kernel(x_ref, o_ref, scratch, *, h_pad):
    # x_ref / o_ref: (ppb, H, W) unpadded blocks straight from HBM.
    # scratch:       (ppb * h_pad, w_pad) f32, (8,128)-aligned, zero-framed.
    ppb, h, w = x_ref.shape
    th, w_pad = scratch.shape

    # Re-zero the frame every step: steps are self-contained, so the
    # "parallel" grid axis is safe on megacore (no cross-step scratch state).
    scratch[...] = jnp.zeros_like(scratch)

    # Drop each plane into its zero-framed slot (sublane offset p*h_pad is a
    # multiple of 8, lane offset 0 — aligned masked stores).
    for p in range(ppb):
        scratch[pl.ds(p * h_pad, h), pl.ds(0, w)] = x_ref[p].astype(jnp.float32)

    x = scratch[...]

    # Horizontal neighbours: the lane roll wraps into guaranteed-zero padding
    # columns, reproducing the conv's padding=1 with no masks/selects.
    xl = pltpu.roll(x, 1, axis=1)             # x[:, j-1]
    xr = pltpu.roll(x, w_pad - 1, axis=1)     # x[:, j+1]

    hdiff = xl - xr                 # inner term of Sobel-x
    hsum = xl + 2.0 * x + xr        # inner term of Sobel-y

    # Vertical neighbours: the sublane roll wraps into the zero rows that
    # separate plane slots (tile wrap-around row is zero too).
    up_d = pltpu.roll(hdiff, 1, axis=0)       # hdiff[i-1, :]
    dn_d = pltpu.roll(hdiff, th - 1, axis=0)  # hdiff[i+1, :]
    up_s = pltpu.roll(hsum, 1, axis=0)
    dn_s = pltpu.roll(hsum, th - 1, axis=0)

    sx = up_d + 2.0 * hdiff + dn_d   # convx (cross-correlation, taps hard-coded)
    sy = up_s - dn_s                 # convy (cross-correlation)
    res = jnp.abs(sx) + jnp.abs(sy)

    # Copy the valid region of each slot back to the unpadded output block
    # (aligned sublane offset, lane offset 0).
    for p in range(ppb):
        o_ref[p] = res[p * h_pad:p * h_pad + h, :w].astype(o_ref.dtype)


def sobelxy(x, *, scratch_budget_bytes=1 << 20,
            vmem_limit_bytes=32 * 1024 * 1024, max_planes_per_block=32):
    """|sobel_x(x)| + |sobel_y(x)| with depthwise 3x3 conv, padding=1 (NCHW)."""
    n, c, h, w = x.shape
    nc = n * c

    # Per-plane slot sizes inside the VMEM scratch: >= 1 spare zero row and
    # column so the rolls wrap into zeros; keep (8,128) alignment for rolls.
    h_pad = _round_up(h + 1, 8)
    w_pad = _round_up(w + 1, 128)
    padded_plane_bytes = h_pad * w_pad * 4  # f32 scratch

    ppb = max(1, min(nc, scratch_budget_bytes // max(1, padded_plane_bytes),
                     max_planes_per_block))
    nsteps = pl.cdiv(nc, ppb)
    if nc >= 2:
        nsteps = max(nsteps, 2)      # ensure both v7x TensorCores get work
    ppb = pl.cdiv(nc, nsteps)        # rebalance: minimal waste in last block
    nsteps = pl.cdiv(nc, ppb)

    xv = jnp.reshape(x, (nc, h, w))  # free view, no HBM copy
    spec = pl.BlockSpec((ppb, h, w), lambda i: (i, 0, 0))

    out = pl.pallas_call(
        functools.partial(_sobelxy_kernel, h_pad=h_pad),
        out_shape=jax.ShapeDtypeStruct((nc, h, w), x.dtype),
        grid=(nsteps,),
        in_specs=[spec],
        out_specs=spec,
        scratch_shapes=[pltpu.VMEM((ppb * h_pad, w_pad), jnp.float32)],
        compiler_params=pltpu.CompilerParams(
            dimension_semantics=("parallel",),
            vmem_limit_bytes=vmem_limit_bytes,
        ),
    )(xv)

    return jnp.reshape(out, (n, c, h, w))


def sobelxy_reference(x, wx, wy):
    # Plain-JAX depthwise conv reference (same semantics as the PyTorch module).
    c = x.shape[1]
    kx = jnp.broadcast_to(wx, (c, 1, 3, 3))
    ky = jnp.broadcast_to(wy, (c, 1, 3, 3))

    def conv(k):
        return jax.lax.conv_general_dilated(
            x, k, window_strides=(1, 1), padding=((1, 1), (1, 1)),
            feature_group_count=c, dimension_numbers=("NCHW", "OIHW", "NCHW"),
        )

    return jnp.abs(conv(kx)) + jnp.abs(conv(ky))


if __name__ == "__main__":
    # The module's fixed Sobel taps (broadcast to every channel by copy_ on the
    # grouped conv weight); used only by the reference check — the kernel
    # hard-codes the identical constants via the separable decomposition.
    sobel = jnp.array([[1.0, 0.0, -1.0],
                       [2.0, 0.0, -2.0],
                       [1.0, 0.0, -1.0]], dtype=jnp.float32)

    key = jax.random.PRNGKey(0)
    x = jax.random.normal(key, (2, 4, 16, 16), dtype=jnp.float32)

    out = sobelxy(x)
    out = jax.block_until_ready(out)

    ref = sobelxy_reference(x, sobel, sobel.T)
    assert out.shape == ref.shape and out.dtype == ref.dtype
    assert jnp.allclose(out, ref, atol=1e-5, rtol=1e-5), "mismatch vs reference conv"

    print("KERNEL_OK")
</pallas_src>

<mosaic_0001>
module attributes {stable_mosaic.version = 11 : i64} {
  func.func @_sobelxy_kernel(%arg0: i32, %arg1: memref<4x16x16xf32, #tpu.memory_space<vmem>>, %arg2: memref<4x16x16xf32, #tpu.memory_space<vmem>>, %arg3: memref<96x128xf32, #tpu.memory_space<vmem>>) attributes {dimension_semantics = [#tpu.dimension_semantics<parallel>], iteration_bounds = array<i64: 2>, scalar_prefetch = 0 : i64, scratch_operands = 1 : i64, tpu.core_type = #tpu.core_type<tc>, window_params = [{transform_indices = @transform_0, window_bounds = array<i64: 4, 16, 16>}, {transform_indices = @transform_1, window_bounds = array<i64: 4, 16, 16>}]} {
    %cst = arith.constant 0.000000e+00 : f32
    %0 = vector.broadcast %cst : f32 to vector<96x128xf32>
    %c0 = arith.constant 0 : index
    %c0_0 = arith.constant 0 : index
    %1 = vector.load %arg3[%c0, %c0_0] : memref<96x128xf32, #tpu.memory_space<vmem>>, vector<96x128xf32>
    tpu.vector_store %arg3[%c0, %c0_0], %0 {strides = array<i32>} : memref<96x128xf32, #tpu.memory_space<vmem>>, vector<96x128xf32>,
    %c0_1 = arith.constant 0 : index
    %c0_2 = arith.constant 0 : index
    %c0_3 = arith.constant 0 : index
    %2 = vector.load %arg1[%c0_1, %c0_2, %c0_3] : memref<4x16x16xf32, #tpu.memory_space<vmem>>, vector<1x16x16xf32>
    %3 = vector.shape_cast %2 : vector<1x16x16xf32> to vector<16x16xf32>
    %c0_4 = arith.constant 0 : index
    %c0_5 = arith.constant 0 : index
    %4 = vector.load %arg3[%c0_4, %c0_5] : memref<96x128xf32, #tpu.memory_space<vmem>>, vector<16x16xf32>
    tpu.vector_store %arg3[%c0_4, %c0_5], %3 {strides = array<i32>} : memref<96x128xf32, #tpu.memory_space<vmem>>, vector<16x16xf32>,
    %c1 = arith.constant 1 : index
    %c0_6 = arith.constant 0 : index
    %c0_7 = arith.constant 0 : index
    %5 = vector.load %arg1[%c1, %c0_6, %c0_7] : memref<4x16x16xf32, #tpu.memory_space<vmem>>, vector<1x16x16xf32>
    %6 = vector.shape_cast %5 : vector<1x16x16xf32> to vector<16x16xf32>
    %c24 = arith.constant 24 : index
    %c0_8 = arith.constant 0 : index
    %7 = vector.load %arg3[%c24, %c0_8] : memref<96x128xf32, #tpu.memory_space<vmem>>, vector<16x16xf32>
    tpu.vector_store %arg3[%c24, %c0_8], %6 {strides = array<i32>} : memref<96x128xf32, #tpu.memory_space<vmem>>, vector<16x16xf32>,
    %c2 = arith.constant 2 : index
    %c0_9 = arith.constant 0 : index
    %c0_10 = arith.constant 0 : index
    %8 = vector.load %arg1[%c2, %c0_9, %c0_10] : memref<4x16x16xf32, #tpu.memory_space<vmem>>, vector<1x16x16xf32>
    %9 = vector.shape_cast %8 : vector<1x16x16xf32> to vector<16x16xf32>
    %c48 = arith.constant 48 : index
    %c0_11 = arith.constant 0 : index
    %10 = vector.load %arg3[%c48, %c0_11] : memref<96x128xf32, #tpu.memory_space<vmem>>, vector<16x16xf32>
    tpu.vector_store %arg3[%c48, %c0_11], %9 {strides = array<i32>} : memref<96x128xf32, #tpu.memory_space<vmem>>, vector<16x16xf32>,
    %c3 = arith.constant 3 : index
    %c0_12 = arith.constant 0 : index
    %c0_13 = arith.constant 0 : index
    %11 = vector.load %arg1[%c3, %c0_12, %c0_13] : memref<4x16x16xf32, #tpu.memory_space<vmem>>, vector<1x16x16xf32>
    %12 = vector.shape_cast %11 : vector<1x16x16xf32> to vector<16x16xf32>
    %c72 = arith.constant 72 : index
    %c0_14 = arith.constant 0 : index
    %13 = vector.load %arg3[%c72, %c0_14] : memref<96x128xf32, #tpu.memory_space<vmem>>, vector<16x16xf32>
    tpu.vector_store %arg3[%c72, %c0_14], %12 {strides = array<i32>} : memref<96x128xf32, #tpu.memory_space<vmem>>, vector<16x16xf32>,
    %c0_15 = arith.constant 0 : index
    %c0_16 = arith.constant 0 : index
    %14 = vector.load %arg3[%c0_15, %c0_16] : memref<96x128xf32, #tpu.memory_space<vmem>>, vector<96x128xf32>
    %c1_i32 = arith.constant 1 : i32
    %15 = tpu.dynamic_rotate %14 by %c1_i32 dim 1 : vector<96x128xf32>, i32 -> vector<96x128xf32>
    %c127_i32 = arith.constant 127 : i32
    %16 = tpu.dynamic_rotate %14 by %c127_i32 dim 1 : vector<96x128xf32>, i32 -> vector<96x128xf32>
    %17 = arith.subf %15, %16 : vector<96x128xf32>
    %cst_17 = arith.constant 2.000000e+00 : f32
    %18 = vector.broadcast %cst_17 : f32 to vector<96x128xf32>
    %19 = arith.mulf %18, %14 : vector<96x128xf32>
    %20 = arith.addf %15, %19 : vector<96x128xf32>
    %21 = arith.addf %20, %16 : vector<96x128xf32>
    %c1_i32_18 = arith.constant 1 : i32
    %22 = tpu.dynamic_rotate %17 by %c1_i32_18 dim 0 : vector<96x128xf32>, i32 -> vector<96x128xf32>
    %c95_i32 = arith.constant 95 : i32
    %23 = tpu.dynamic_rotate %17 by %c95_i32 dim 0 : vector<96x128xf32>, i32 -> vector<96x128xf32>
    %c1_i32_19 = arith.constant 1 : i32
    %24 = tpu.dynamic_rotate %21 by %c1_i32_19 dim 0 : vector<96x128xf32>, i32 -> vector<96x128xf32>
    %c95_i32_20 = arith.constant 95 : i32
    %25 = tpu.dynamic_rotate %21 by %c95_i32_20 dim 0 : vector<96x128xf32>, i32 -> vector<96x128xf32>
    %cst_21 = arith.constant 2.000000e+00 : f32
    %26 = vector.broadcast %cst_21 : f32 to vector<96x128xf32>
    %27 = arith.mulf %26, %17 : vector<96x128xf32>
    %28 = arith.addf %22, %27 : vector<96x128xf32>
    %29 = arith.addf %28, %23 : vector<96x128xf32>
    %30 = arith.subf %24, %25 : vector<96x128xf32>
    %31 = math.absf %29 : vector<96x128xf32>
    %32 = math.absf %30 : vector<96x128xf32>
    %33 = arith.addf %31, %32 : vector<96x128xf32>
    %34 = vector.extract_strided_slice %33 {offsets = [0, 0], sizes = [16, 16], strides = [1, 1]} : vector<96x128xf32> to vector<16x16xf32>
    %c0_22 = arith.constant 0 : index
    %c0_23 = arith.constant 0 : index
    %c0_24 = arith.constant 0 : index
    %35 = vector.load %arg2[%c0_22, %c0_23, %c0_24] : memref<4x16x16xf32, #tpu.memory_space<vmem>>, vector<1x16x16xf32>
    %36 = vector.shape_cast %35 : vector<1x16x16xf32> to vector<16x16xf32>
    %37 = vector.shape_cast %34 : vector<16x16xf32> to vector<1x16x16xf32>
    tpu.vector_store %arg2[%c0_22, %c0_23, %c0_24], %37 {strides = array<i32>} : memref<4x16x16xf32, #tpu.memory_space<vmem>>, vector<1x16x16xf32>,
    %38 = vector.extract_strided_slice %33 {offsets = [24, 0], sizes = [16, 16], strides = [1, 1]} : vector<96x128xf32> to vector<16x16xf32>
    %c1_25 = arith.constant 1 : index
    %c0_26 = arith.constant 0 : index
    %c0_27 = arith.constant 0 : index
    %39 = vector.load %arg2[%c1_25, %c0_26, %c0_27] : memref<4x16x16xf32, #tpu.memory_space<vmem>>, vector<1x16x16xf32>
    %40 = vector.shape_cast %39 : vector<1x16x16xf32> to vector<16x16xf32>
    %41 = vector.shape_cast %38 : vector<16x16xf32> to vector<1x16x16xf32>
    tpu.vector_store %arg2[%c1_25, %c0_26, %c0_27], %41 {strides = array<i32>} : memref<4x16x16xf32, #tpu.memory_space<vmem>>, vector<1x16x16xf32>,
    %42 = vector.extract_strided_slice %33 {offsets = [48, 0], sizes = [16, 16], strides = [1, 1]} : vector<96x128xf32> to vector<16x16xf32>
    %c2_28 = arith.constant 2 : index
    %c0_29 = arith.constant 0 : index
    %c0_30 = arith.constant 0 : index
    %43 = vector.load %arg2[%c2_28, %c0_29, %c0_30] : memref<4x16x16xf32, #tpu.memory_space<vmem>>, vector<1x16x16xf32>
    %44 = vector.shape_cast %43 : vector<1x16x16xf32> to vector<16x16xf32>
    %45 = vector.shape_cast %42 : vector<16x16xf32> to vector<1x16x16xf32>
    tpu.vector_store %arg2[%c2_28, %c0_29, %c0_30], %45 {strides = array<i32>} : memref<4x16x16xf32, #tpu.memory_space<vmem>>, vector<1x16x16xf32>,
    %46 = vector.extract_strided_slice %33 {offsets = [72, 0], sizes = [16, 16], strides = [1, 1]} : vector<96x128xf32> to vector<16x16xf32>
    %c3_31 = arith.constant 3 : index
    %c0_32 = arith.constant 0 : index
    %c0_33 = arith.constant 0 : index
    %47 = vector.load %arg2[%c3_31, %c0_32, %c0_33] : memref<4x16x16xf32, #tpu.memory_space<vmem>>, vector<1x16x16xf32>
    %48 = vector.shape_cast %47 : vector<1x16x16xf32> to vector<16x16xf32>
    %49 = vector.shape_cast %46 : vector<16x16xf32> to vector<1x16x16xf32>
    tpu.vector_store %arg2[%c3_31, %c0_32, %c0_33], %49 {strides = array<i32>} : memref<4x16x16xf32, #tpu.memory_space<vmem>>, vector<1x16x16xf32>,
    return
  }
  func.func @transform_0(%arg0: i32) -> (i32, i32, i32) {
    %c0_i32 = arith.constant 0 : i32
    %c0_i32_0 = arith.constant 0 : i32
    %c0_i32_1 = arith.constant 0 : i32
    return %arg0, %c0_i32, %c0_i32_0 : i32, i32, i32
  }
  func.func @transform_1(%arg0: i32) -> (i32, i32, i32) {
    %c0_i32 = arith.constant 0 : i32
    %c0_i32_0 = arith.constant 0 : i32
    %c0_i32_1 = arith.constant 0 : i32
    return %arg0, %c0_i32, %c0_i32_0 : i32, i32, i32
  }
}

</mosaic_0001>

<bundles_post_ra>
// kernel: tpu_custom_call.1
= control target key start
LH: loop header
LB: loop body
LE: loop exit
PB: predicated region body
PF: predicated region fallthrough
CT: control target
= control target key end

     0   :  { %6 = vsyncpa [#allocation4], 0  ;;  %s1046_s0 = inlined_call_operand.hbm [shape: f32[8,16,16], index: 0, kind: input, shape index: {}]   ;;  %s1047_s1 = inlined_call_operand.hbm [shape: f32[8,16,16], index: 1, kind: output, shape index: {}]  }
   0x1   :  { %8 = vsyncpa [#allocation4 + $0x1], 0 }
   0x2   :  { %9 = vsyncpa [#allocation5], 0 }
   0x3   :  { %11 = vsyncpa [#allocation5 + $0x1], 0  ;;  %s721_s6 = smov 0   ;;  %s723_s7 = smov 0  }
   0x4   :  { %s725_s8 = smov 0   ;;  %s727_s9 = smov 0  }
   0x5 LB: > { %s742_s10 = sadd.s32 4294967295, %s702_s9   ;;  %s521_s11 = sadd.s32 4294967294, %s702_s9   ;;  %s702_s9 = sphi %s727_s9, %s1057_s9   ;;  %s698_s8 = sphi %s725_s8, %s1056_s8   ;;  %s694_s7 = sphi %s723_s7, %s1055_s7   ;;  %s690_s6 = sphi %s721_s6, %s1054_s6  }
   0x6   : > { %s746_s12 = sadd.s32 1, %s702_s9   ;;  %s24_s13 = sadd.s32 1, %s698_s8 }
   0x7   : > { %s21_s14 = ssub.s32 %s702_s9, %s746_s12  ;;  %p31_p0 = scmp.ne.s32.totalorder %s698_s8, %s694_s7 }
   0x8   : > { %p22_p1 = scmp.eq.s32.totalorder %s21_s14, 0  ;;  %p32_p2 = scmp.eq.s32.totalorder %s702_s9, 0 }
   0x9   : > { %p37_p3 = scmp.ne.s32.totalorder %s694_s7, %s690_s6  ;;  %p38_p4 = scmp.eq.s32.totalorder %s742_s10, 0 }
   0xa   : > { %s758_s15 = scalar_select %p22_p1, %s698_s8, %s24_s13  }
   0xb   : > { %p760_p5 = por %p32_p2, %p31_p0  ;;  %p764_p6 = por %p38_p4, %p37_p3 }
   0xc   : > { %p61_p7 = scmp.eq.s32.totalorder %s742_s10, 1  ;;  %p67_p8 = scmp.eq.s32.totalorder %s521_s11, 1 }
   0xd   : > { %p565_p10 = scmp.lt.s32.totalorder %s702_s9, 2  ;;  %s87_s20 = sand.u32 1, %s698_s8  }
   0xe   : > { %p771_p11 = por %p61_p7, %p31_p0  ;;  %p775_p12 = por %p67_p8, %p37_p3 }
   0xf   : > { %s550_s21 = sshll.u32 %s702_s9, 6  ;;  %s524_s22 = sshll.u32 %s87_s20, 6 }
  0x10   : > { %s97_s25 = scalar_lea.hbm %s1046_s0, %s550_s21  ;;  %s91_s27 = scalar_lea.vmem [#allocation3], %s524_s22 }
  0x11   : > { %s98_s26 = sshll.u32 %s97_s25, 4  ;;  %s100_s28 = sshll.u32 %s91_s27, 4  ;;  %s99_s26 = int_to_ptr.hbm [resolvable:$true] %s98_s26  ;;  %s101_s28 = int_to_ptr.vmem [resolvable:$true] %s100_s28 }
  0x12   : > { %p786_p13 = pnand %p565_p10, %p760_p5  ;;  %p528_p0 = scmp.ge.s32.totalorder %s702_s9, 1 }
  0x13   : > { %p108_p1 = scmp.lt.s32.totalorder %s702_s9, 3  ;;  %s88_s30 = scalar_lea.sflag [#allocation4], %s87_s20 }
  0x14   : > { %s606_s2 = sshra.s32 %s99_s26, 4  ;;  %p610_p3 = pneg %p786_p13  ;;  %s607_s2 = int_to_ptr.hbm [resolvable:$true] %s606_s2 }
  0x15   : > { %s608_s3 = scalar_lea.hbm %s607_s2, 64  ;;  %s613_s11 = scalar_lea.hbm %s1046_s0, 128 }
  0x16   : > { %p609_p2 = scmp.ne.s32.totalorder %s607_s2, %s608_s3  ;;  %p614_p5 = scmp.lt.s32.totalorder %s607_s2, %s1046_s0 }
  0x17   : > { %p615_p8 = scmp.lt.s32.totalorder %s613_s11, %s608_s3 }
  0x18   : > { %p611_p4 = pnand %p610_p3, %p609_p2 }
  0x19   : > { %p616_p10 = por %p615_p8, %p614_p5 }
  0x1a   : > { %p612_p7 = pneg %p611_p4 }
  0x1c   : > { %p617_p9 = pnand %p616_p10, %p612_p7 }
  0x1e   : > { %620 = shalt.err (!%p617_p9)
}
  0x1f   : > { %s704_s16 = smov 128   ;;  %s705_s20 = smov 8  }
  0x20   : > { %560 = dma.hbm_to_vmem [thread:$0]  (!%p786_p13), %s99_s26, 1024, %s101_s28, %s88_s30, %s704_s16, %s704_s16, %s705_s20  }
  0x21   : > { %p109_p2 = pnand %p528_p0, %p108_p1 }
  0x22   : > { %s807_s21 = sand.u32 (!%p109_p2), 1, %s694_s7  }
  0x23   : > { %112 = sbr.rel (%p109_p2) target bundleno = 247 (0xf7), region = 24  ;;  %s529_s22 = sshll.u32 (!%p109_p2), %s807_s21, 6 }
  0x24   : > { %s115_s23 = scalar_lea.sflag (!%p109_p2), [#allocation4], %s807_s21  ;;  %s118_s24 = scalar_lea.vmem (!%p109_p2), [#allocation3], %s529_s22 }
  0x28   : > { %681 = dma.done.wait (%p764_p6), %s115_s23, 1024  }
  0x29   : > { %683 = vsyncadd (%p764_p6), %s115_s23, 4294966272  ;;  %v706_v0 = vmov 0.0   ;;  %s707_s25 = smov 1   ;;  %v152_v1 = vld [vmem:[%s118_s24] sm:$0xff]  ;;  %vm154_vm0 = vcmask 130048   ;;  %v531_v2 = vld [vmem:[%s118_s24 + $0x10] sm:$0xff]  ;;  %v292_v31 = vlaneseq }
  0x2a   : > { %194 = vrot.lane.b32.xlu2 %v706_v0, %s707_s25  ;;  %188 = vrot.lane.b32.xlu1 %v706_v0, %s707_s25  ;;  %140 = vst [vmem:[#allocation2] sm:$0xff] %v706_v0  ;;  %v153_v3 = vld [vmem:[%s118_s24 + $0x8] sm:$0xff]  ;;  %v532_v4 = vld [vmem:[%s118_s24 + $0x18] sm:$0xff]  ;;  %s708_s17 = smov 127   ;;  %s924_s26 = scalar_lea.vmem [#allocation6], %s529_s22 }
  0x2b   : > { %141 = vst [vmem:[#allocation2 + $0x8] sm:$0xff] %v706_v0  ;;  %v534_v5 = vld [vmem:[%s118_s24 + $0x28] sm:$0xff]  ;;  %v533_v6 = vld [vmem:[%s118_s24 + $0x20] sm:$0xff]  ;;  %v536_v7 = vld [vmem:[%s118_s24 + $0x38] sm:$0xff]  ;;  %v847_v33 = vshrl.u32 %v292_v31, 7  ;;  %s552_s27 = sshll.u32 %s742_s10, 6 }
  0x2c   : > { %143 = vst [vmem:[#allocation2 + $0x18] sm:$0xff] %v706_v0  ;;  %v535_v8 = vld [vmem:[%s118_s24 + $0x30] sm:$0xff]  ;;  %s444_s29 = scalar_lea.hbm %s1047_s1, %s552_s27  ;;  %s445_s30 = sshll.u32 %s924_s26, 4  ;;  %s446_s30 = int_to_ptr.vmem [resolvable:$true] %s445_s30 }
  0x2d   : > { %144 = vst [vmem:[#allocation2 + $0x20] sm:$0xff] %v706_v0  ;;  %vm315_vm1 = vcmp.lt.s32.totalorder %v847_v33, 7  ;;  %vm294_vm2 = vcmp.lt.s32.totalorder %v847_v33, 1  ;;  %s447_s2 = sshll.u32 %s444_s29, 4  ;;  %s432_s3 = scalar_lea.sflag [#allocation5], %s807_s21  ;;  %s448_s2 = int_to_ptr.hbm [resolvable:$true] %s447_s2 }
  0x2e   : > { %146 = vst [vmem:[#allocation2 + $0x30] sm:$0xff] %v706_v0  ;;  %s650_s4 = sshra.s32 %s448_s2, 4  ;;  %s656_s14 = scalar_lea.hbm %s1047_s1, 128  ;;  %s651_s4 = int_to_ptr.hbm [resolvable:$true] %s650_s4 }
  0x2f   : > { %147 = vst [vmem:[#allocation2 + $0x38] sm:$0xff] %v706_v0  ;;  %s652_s5 = scalar_lea.hbm %s651_s4, 64  ;;  %p657_p0 = scmp.lt.s32.totalorder %s651_s4, %s1047_s1 }
  0x30   : > { %149 = vst [vmem:[#allocation2 + $0x48] sm:$0xff] %v706_v0  ;;  %p653_p6 = scmp.ne.s32.totalorder %s651_s4, %s652_s5  ;;  %p658_p1 = scmp.lt.s32.totalorder %s656_s14, %s652_s5 }
  0x31   : > { %150 = vst [vmem:[#allocation2 + $0x50] sm:$0xff] %v706_v0 }
  0x32   : > { %200 = vrot.lane.b32.xlu2 %v706_v0, %s707_s25  ;;  %155 = vst.msk [vmem:[#allocation2] sm:$0xff] %vm154_vm0, %v152_v1  ;;  %p654_p9 = pnand %p653_p6, %p771_p11  ;;  %p659_p3 = por %p658_p1, %p657_p0 }
  0x33   : > { %160 = vst.msk [vmem:[#allocation2 + $0x18] sm:$0xff] %vm154_vm0, %v531_v2 }
  0x34   : > { %156 = vst.msk [vmem:[#allocation2 + $0x8] sm:$0xff] %vm154_vm0, %v153_v3  ;;  %p655_p13 = pneg %p654_p9 }
  0x35   : > { %161 = vst.msk [vmem:[#allocation2 + $0x20] sm:$0xff] %vm154_vm0, %v532_v4 }
  0x36   : > { %166 = vst.msk [vmem:[#allocation2 + $0x38] sm:$0xff] %vm154_vm0, %v534_v5  ;;  %p660_p4 = pnand %p659_p3, %p655_p13 }
  0x37   : > { %165 = vst.msk [vmem:[#allocation2 + $0x30] sm:$0xff] %vm154_vm0, %v533_v6 }
  0x38   : > { %171 = vst.msk [vmem:[#allocation2 + $0x50] sm:$0xff] %vm154_vm0, %v536_v7 }
  0x39   : > { %v172_v9 = vld [vmem:[#allocation2] sm:$0xff]  ;;  %170 = vst.msk [vmem:[#allocation2 + $0x48] sm:$0xff] %vm154_vm0, %v535_v8 }
  0x3a   : > { %184 = vrot.lane.b32.xlu0 %v172_v9, %s707_s25  ;;  %v175_v10 = vld [vmem:[#allocation2 + $0x18] sm:$0xff]  ;;  %v244_v36 = vmul.f32 2.0, %v172_v9 }
  0x3b   : > { %190 = vrot.lane.b32.xlu1 %v175_v10, %s707_s25  ;;  %v173_v12 = vld [vmem:[#allocation2 + $0x8] sm:$0xff]  ;;  %v247_v37 = vmul.f32 2.0, %v175_v10 }
  0x3c   : > { %v176_v11 = vld [vmem:[#allocation2 + $0x20] sm:$0xff]  ;;  %v245_v38 = vmul.f32 2.0, %v173_v12 }
  0x3d   : > { %192 = vrot.lane.b32.xlu2 %v176_v11, %s707_s25  ;;  %v179_v13 = vld [vmem:[#allocation2 + $0x38] sm:$0xff]  ;;  %v248_v32 = vmul.f32 2.0, %v176_v11 }
  0x3e   : > { %v178_v14 = vld [vmem:[#allocation2 + $0x30] sm:$0xff]  ;;  %v251_v40 = vmul.f32 2.0, %v179_v13 }
  0x3f   : > { %v182_v15 = vld [vmem:[#allocation2 + $0x50] sm:$0xff]  ;;  %v250_v41 = vmul.f32 2.0, %v178_v14 }
  0x40   : > { %v181_v16 = vld [vmem:[#allocation2 + $0x48] sm:$0xff]  ;;  %v254_v42 = vmul.f32 2.0, %v182_v15 }
  0x41   : > { %v858_v45 = vmul.f32 2.0, %v181_v16 }
  0x42   : > { %186 = vrot.lane.b32.xlu0 %v173_v12, %s707_s25 }
  0x43   : > { %198 = vrot.lane.b32.xlu1 %v179_v13, %s707_s25 }
  0x45   : > { %206 = vrot.lane.b32.xlu2 %v706_v0, %s707_s25 }
  0x4a   : > { %196 = vrot.lane.b32.xlu0 %v178_v14, %s707_s25 }
  0x4b   : > { %204 = vrot.lane.b32.xlu1 %v182_v15, %s707_s25 }
  0x4d   : > { %212 = vrot.lane.b32.xlu2 %v706_v0, %s708_s17 }
  0x52   : > { %202 = vrot.lane.b32.xlu0 %v181_v16, %s707_s25 }
  0x53   : > { %210 = vrot.lane.b32.xlu1 %v173_v12, %s708_s17 }
  0x55   : > { %218 = vrot.lane.b32.xlu2 %v706_v0, %s708_s17 }
  0x5a   : > { %208 = vrot.lane.b32.xlu0 %v172_v9, %s708_s17 }
  0x5b   : > { %216 = vrot.lane.b32.xlu1 %v176_v11, %s708_s17 }
  0x5d   : > { %224 = vrot.lane.b32.xlu2 %v706_v0, %s708_s17 }
  0x62   : > { %214 = vrot.lane.b32.xlu0 %v175_v10, %s708_s17 }
  0x63   : > { %222 = vrot.lane.b32.xlu1 %v179_v13, %s708_s17 }
  0x65   : > { %230 = vrot.lane.b32.xlu2 %v706_v0, %s708_s17 }
  0x6a   : > { %220 = vrot.lane.b32.xlu0 %v178_v14, %s708_s17 }
  0x6b   : > { %228 = vrot.lane.b32.xlu1 %v182_v15, %s708_s17 }
  0x72   : > { %226 = vrot.lane.b32.xlu0 %v181_v16, %s708_s17 }
  0x84   : > { %v195_v17 = vpop.permute.xlu2 %194 }
  0x8c   : > { %v201_v18 = vpop.permute.xlu2 %200 }
  0x97   : > { %v837_v19 = vpop.permute.xlu2 %192 }
  0x98   : > { %v260_v39 = vadd.f32 %v248_v32, %v837_v19 }
  0x9c   : > { %v189_v21 = vpop.permute.xlu1 %188 }
  0x9f   : > { %v207_v20 = vpop.permute.xlu2 %206 }
  0xa7   : > { %v213_v22 = vpop.permute.xlu2 %212 }
  0xa8   : > { %v849_v34 = vsub.f32 %v189_v21, %v213_v22  ;;  %v851_v35 = vadd.f32 %v213_v22, %v189_v21 }
  0xaa   : > { %v282_v48 = vrot.slane %v849_v34, 7  ;;  %v305_v49 = vrot.slane %v849_v34, 1  ;;  %v326_v50 = vrot.slane %v851_v35, 7  ;;  %v346_v52 = vrot.slane %v851_v35, 1 }
  0xac   : > { %v185_v23 = vpop.permute.xlu0 %184 }
  0xad   : > { %v839_v24 = vpop.permute.xlu1 %190  ;;  %v256_v56 = vadd.f32 %v244_v36, %v185_v23 }
  0xae   : > { %v259_v59 = vadd.f32 %v247_v37, %v839_v24 }
  0xaf   : > { %v219_v25 = vpop.permute.xlu2 %218 }
  0xb0   : > { %v856_v44 = vsub.f32 %v195_v17, %v219_v25  ;;  %v864_v51 = vadd.f32 %v219_v25, %v195_v17 }
  0xb2   : > { %v285_v60 = vrot.slane %v856_v44, 7  ;;  %v308_v61 = vrot.slane %v856_v44, 1  ;;  %v329_v63 = vrot.slane %v864_v51, 7  ;;  %v349_v0 = vrot.slane %v864_v51, 1 }
  0xb4   : > { %v187_v26 = vpop.permute.xlu0 %186 }
  0xb5   : > { %v841_v27 = vpop.permute.xlu1 %198  ;;  %v257_v53 = vadd.f32 %v245_v38, %v187_v26 }
  0xb6   : > { %v263_v1 = vadd.f32 %v251_v40, %v841_v27 }
  0xb7   : > { %v225_v29 = vpop.permute.xlu2 %224 }
  0xb8   : > { %v867_v54 = vsub.f32 %v201_v18, %v225_v29  ;;  %v869_v55 = vadd.f32 %v225_v29, %v201_v18 }
  0xba   : > { %v288_v3 = vrot.slane %v867_v54, 7  ;;  %v311_v4 = vrot.slane %v867_v54, 1  ;;  %v332_v5 = vrot.slane %v869_v55, 7  ;;  %v352_v6 = vrot.slane %v869_v55, 1 }
  0xbc   : > { %v843_v28 = vpop.permute.xlu0 %196 }
  0xbd   : > { %v845_v30 = vpop.permute.xlu1 %204  ;;  %v887_v7 = vadd.f32 %v250_v41, %v843_v28 }
  0xbe   : > { %v890_v8 = vadd.f32 %v254_v42, %v845_v30 }
  0xbf   : > { %v231_v46 = vpop.permute.xlu2 %230 }
  0xc0   : > { %v871_v57 = vsub.f32 %v207_v20, %v231_v46  ;;  %v880_v2 = vadd.f32 %v231_v46, %v207_v20 }
  0xc2   : > { %v291_v9 = vrot.slane %v871_v57, 7  ;;  %v314_v12 = vrot.slane %v871_v57, 1  ;;  %v335_v17 = vrot.slane %v880_v2, 7 }
  0xc4   : > { %v854_v43 = vpop.permute.xlu0 %202 }
  0xc5   : > { %v211_v47 = vpop.permute.xlu1 %210  ;;  %v265_v51 = vadd.f32 %v858_v45, %v854_v43 }
  0xc6   : > { %v233_v58 = vsub.f32 %v187_v26, %v211_v47  ;;  %v269_v62 = vadd.f32 %v257_v53, %v211_v47 }
  0xc8   : > { %v304_v10 = vrot.slane %v233_v58, 1  ;;  %v345_v13 = vrot.slane %v269_v62, 1  ;;  %v281_v18 = vrot.slane %v233_v58, 7  ;;  %v325_v20 = vrot.slane %v269_v62, 7 }
  0xc9   : > { %v365_v32 = vmul.f32 2.0, %v233_v58 }
  0xca   : > { %v322_v31 = vsel %vm315_vm1, %v304_v10, %v305_v49 }
  0xcc   : > { %v209_v11 = vpop.permute.xlu0 %208 }
  0xcd   : > { %v232_v14 = vsub.f32 %v185_v23, %v209_v11  ;;  %v268_v15 = vadd.f32 %v256_v56, %v209_v11  ;;  %v217_v16 = vpop.permute.xlu1 %216  ;;  %v362_v23 = vsel %vm315_vm1, %v345_v13, %v346_v52 }
  0xce   : > { %v272_v21 = vadd.f32 %v260_v39, %v217_v16  ;;  %v236_v37 = vsub.f32 %v837_v19, %v217_v16 }
  0xcf   : > { %v280_v22 = vrot.slane %v232_v14, 7  ;;  %v303_v25 = vrot.slane %v232_v14, 1  ;;  %v324_v26 = vrot.slane %v268_v15, 7  ;;  %v344_v29 = vrot.slane %v268_v15, 1 }
  0xd0   : > { %v364_v36 = vmul.f32 2.0, %v232_v14  ;;  %v348_v53 = vrot.slane %v272_v21, 1  ;;  %v284_v62 = vrot.slane %v236_v37, 7  ;;  %v328_v15 = vrot.slane %v272_v21, 7 }
  0xd1   : > { %v301_v38 = vsel %vm294_vm2, %v280_v22, %v281_v18  ;;  %v302_v39 = vsel %vm294_vm2, %v291_v9, %v280_v22  ;;  %v342_v40 = vsel %vm294_vm2, %v324_v26, %v325_v20  ;;  %v343_v41 = vsel %vm294_vm2, %v335_v17, %v324_v26 }
  0xd2   : > { %v363_v42 = vsel %vm315_vm1, %v344_v29, %v345_v13  ;;  %v372_v46 = vadd.f32 %v364_v36, %v302_v39  ;;  %v373_v19 = vadd.f32 %v365_v32, %v301_v38  ;;  %v323_v47 = vsel %vm315_vm1, %v303_v25, %v304_v10 }
  0xd3   : > { %v388_v49 = vsub.f32 %v343_v41, %v363_v42  ;;  %v389_v52 = vsub.f32 %v342_v40, %v362_v23  ;;  %v307_v9 = vrot.slane %v236_v37, 1  ;;  %v360_v16 = vsel %vm315_vm1, %v348_v53, %v349_v0 }
  0xd4   : > { %v380_v56 = vadd.f32 %v372_v46, %v323_v47  ;;  %v381_v58 = vadd.f32 %v373_v19, %v322_v31  ;;  %v215_v11 = vpop.permute.xlu0 %214  ;;  %v367_v21 = vmul.f32 2.0, %v236_v37  ;;  %v355_v42 = vrot.slane %v880_v2, 1 }
  0xd5   : > { %v404_v14 = vand.u32 2147483647, %v388_v49  ;;  %v235_v13 = vsub.f32 %v839_v24, %v215_v11  ;;  %v223_v17 = vpop.permute.xlu1 %222  ;;  %v405_v10 = vand.u32 2147483647, %v389_v52  ;;  %v271_v22 = vadd.f32 %v259_v59, %v215_v11 }
  0xd6   : > { %v396_v18 = vand.u32 2147483647, %v380_v56  ;;  %v397_v20 = vand.u32 2147483647, %v381_v58  ;;  %v275_v31 = vadd.f32 %v263_v1, %v223_v17  ;;  %v239_v39 = vsub.f32 %v841_v27, %v223_v17 }
  0xd7   : > { %v283_v25 = vrot.slane %v235_v13, 7  ;;  %v306_v26 = vrot.slane %v235_v13, 1  ;;  %v366_v29 = vmul.f32 2.0, %v235_v13  ;;  %v327_v23 = vrot.slane %v271_v22, 7 }
  0xd8   : > { %v412_v32 = vadd.f32 %v404_v14, %v396_v18  ;;  %v413_v36 = vadd.f32 %v405_v10, %v397_v20  ;;  %v347_v38 = vrot.slane %v271_v22, 1  ;;  %v320_v35 = vsel %vm315_vm1, %v307_v9, %v308_v61 }
  0xd9   : > { %v299_v0 = vsel %vm294_vm2, %v283_v25, %v284_v62  ;;  %v300_v24 = vsel %vm294_vm2, %v282_v48, %v283_v25  ;;  %v340_v59 = vsel %vm294_vm2, %v327_v23, %v328_v15  ;;  %v341_v34 = vsel %vm294_vm2, %v326_v50, %v327_v23 }
  0xda   : > { %420 = vst.msk [vmem:[%s924_s26] sm:$0xff] %vm154_vm0, %v412_v32  ;;  %v361_v48 = vsel %vm315_vm1, %v347_v38, %v348_v53  ;;  %v374_v1 = vadd.f32 %v366_v29, %v300_v24  ;;  %v321_v27 = vsel %vm315_vm1, %v306_v26, %v307_v9  ;;  %v375_v37 = vadd.f32 %v367_v21, %v299_v0 }
  0xdb   : > { %421 = vst.msk [vmem:[%s924_s26 + $0x8] sm:$0xff] %vm154_vm0, %v413_v36  ;;  %v390_v40 = vsub.f32 %v341_v34, %v361_v48  ;;  %v391_v41 = vsub.f32 %v340_v59, %v360_v16  ;;  %v351_v46 = vrot.slane %v275_v31, 1  ;;  %v287_v49 = vrot.slane %v239_v39, 7 }
  0xdc   : > { %v382_v50 = vadd.f32 %v374_v1, %v321_v27  ;;  %v221_v19 = vpop.permute.xlu0 %220  ;;  %v383_v47 = vadd.f32 %v375_v37, %v320_v35  ;;  %v310_v52 = vrot.slane %v239_v39, 1  ;;  %v331_v53 = vrot.slane %v275_v31, 7 }
  0xdd   : > { %v406_v58 = vand.u32 2147483647, %v390_v40  ;;  %v238_v62 = vsub.f32 %v843_v28, %v221_v19  ;;  %v274_v11 = vadd.f32 %v887_v7, %v221_v19  ;;  %v229_v14 = vpop.permute.xlu1 %228  ;;  %v407_v16 = vand.u32 2147483647, %v391_v41 }
  0xde   : > { %v398_v56 = vand.u32 2147483647, %v382_v50  ;;  %v399_v15 = vand.u32 2147483647, %v383_v47  ;;  %v358_v61 = vsel %vm315_vm1, %v351_v46, %v352_v6  ;;  %v369_v9 = vmul.f32 2.0, %v239_v39 }
  0xdf   : > { %v286_v17 = vrot.slane %v238_v62, 7  ;;  %v309_v18 = vrot.slane %v238_v62, 1  ;;  %v330_v20 = vrot.slane %v274_v11, 7  ;;  %v350_v22 = vrot.slane %v274_v11, 1 }
  0xe0   : > { %v414_v13 = vadd.f32 %v406_v58, %v398_v56  ;;  %v415_v10 = vadd.f32 %v407_v16, %v399_v15  ;;  %v368_v25 = vmul.f32 2.0, %v238_v62  ;;  %v242_v28 = vsub.f32 %v845_v30, %v229_v14 }
  0xe1   : > { %v297_v7 = vsel %vm294_vm2, %v286_v17, %v287_v49  ;;  %v298_v6 = vsel %vm294_vm2, %v285_v60, %v286_v17  ;;  %v338_v26 = vsel %vm294_vm2, %v330_v20, %v331_v53  ;;  %v278_v29 = vadd.f32 %v890_v8, %v229_v14 }
  0xe2   : > { %537 = vst.msk [vmem:[%s924_s26 + $0x10] sm:$0xff] %vm154_vm0, %v414_v13  ;;  %v339_v30 = vsel %vm294_vm2, %v329_v63, %v330_v20  ;;  %v359_v31 = vsel %vm315_vm1, %v350_v22, %v351_v46  ;;  %v376_v32 = vadd.f32 %v368_v25, %v298_v6  ;;  %v377_v44 = vadd.f32 %v369_v9, %v297_v7 }
  0xe3   : > { %538 = vst.msk [vmem:[%s924_s26 + $0x18] sm:$0xff] %vm154_vm0, %v415_v10  ;;  %v318_v60 = vsel %vm315_vm1, %v310_v52, %v311_v4  ;;  %v319_v8 = vsel %vm315_vm1, %v309_v18, %v310_v52  ;;  %v392_v36 = vsub.f32 %v339_v30, %v359_v31  ;;  %v393_v23 = vsub.f32 %v338_v26, %v358_v61 }
  0xe4   : > { %v227_v38 = vpop.permute.xlu0 %226  ;;  %v384_v63 = vadd.f32 %v376_v32, %v319_v8  ;;  %v385_v21 = vadd.f32 %v377_v44, %v318_v60  ;;  %v290_v0 = vrot.slane %v242_v28, 7  ;;  %v313_v39 = vrot.slane %v242_v28, 1 }
  0xe5   : > { %v408_v24 = vand.u32 2147483647, %v392_v36  ;;  %v354_v59 = vrot.slane %v278_v29, 1  ;;  %v241_v34 = vsub.f32 %v854_v43, %v227_v38  ;;  %v409_v1 = vand.u32 2147483647, %v393_v23 }
  0xe6   : > { %v400_v48 = vand.u32 2147483647, %v384_v63  ;;  %v401_v4 = vand.u32 2147483647, %v385_v21  ;;  %v277_v27 = vadd.f32 %v265_v51, %v227_v38  ;;  %v334_v37 = vrot.slane %v278_v29, 7 }
  0xe7   : > { %v289_v40 = vrot.slane %v241_v34, 7  ;;  %v312_v41 = vrot.slane %v241_v34, 1  ;;  %v370_v35 = vmul.f32 2.0, %v241_v34  ;;  %v356_v43 = vsel %vm315_vm1, %v354_v59, %v355_v42 }
  0xe8   : > { %v416_v45 = vadd.f32 %v408_v24, %v400_v48  ;;  %v417_v50 = vadd.f32 %v409_v1, %v401_v4  ;;  %v333_v46 = vrot.slane %v277_v27, 7  ;;  %v353_v19 = vrot.slane %v277_v27, 1 }
  0xe9   : > { %v371_v47 = vmul.f32 2.0, %v242_v28  ;;  %v295_v49 = vsel %vm294_vm2, %v289_v40, %v290_v0  ;;  %v296_v52 = vsel %vm294_vm2, %v288_v3, %v289_v40  ;;  %v317_v54 = vsel %vm315_vm1, %v312_v41, %v313_v39 }
  0xea   : > { %539 = vst.msk [vmem:[%s924_s26 + $0x20] sm:$0xff] %vm154_vm0, %v416_v45  ;;  %v336_v53 = vsel %vm294_vm2, %v333_v46, %v334_v37  ;;  %v337_v2 = vsel %vm294_vm2, %v332_v5, %v333_v46  ;;  %v357_v42 = vsel %vm315_vm1, %v353_v19, %v354_v59  ;;  %v378_v56 = vadd.f32 %v370_v35, %v296_v52 }
  0xeb   : > { %540 = vst.msk [vmem:[%s924_s26 + $0x28] sm:$0xff] %vm154_vm0, %v417_v50  ;;  %v379_v3 = vadd.f32 %v371_v47, %v295_v49  ;;  %v394_v58 = vsub.f32 %v337_v2, %v357_v42  ;;  %v395_v55 = vsub.f32 %v336_v53, %v356_v43  ;;  %v316_v5 = vsel %vm315_vm1, %v313_v39, %v314_v12 }
  0xec   : > { %v386_v62 = vadd.f32 %v378_v56, %v317_v54 }
  0xed   : > { %v387_v11 = vadd.f32 %v379_v3, %v316_v5  ;;  %v410_v15 = vand.u32 2147483647, %v394_v58  ;;  %v411_v61 = vand.u32 2147483647, %v395_v55 }
  0xee   : > { %v402_v14 = vand.u32 2147483647, %v386_v62 }
  0xef   : > { %v403_v16 = vand.u32 2147483647, %v387_v11 }
  0xf0   : > { %v418_v9 = vadd.f32 %v410_v15, %v402_v14 }
  0xf1   : > { %v419_v13 = vadd.f32 %v411_v61, %v403_v16 }
  0xf2   : > { %541 = vst.msk [vmem:[%s924_s26 + $0x30] sm:$0xff] %vm154_vm0, %v418_v9 }
  0xf3   : > { %542 = vst.msk [vmem:[%s924_s26 + $0x38] sm:$0xff] %vm154_vm0, %v419_v13 }
  0xf4   : > { %663 = shalt.err (!%p660_p4)
}
  0xf5   : > { %s709_s21 = smov 128   ;;  %s710_s22 = smov 8  }
  0xf6   : > { %555 = dma.vmem_to_hbm [thread:$0]  (%p771_p11), %s446_s30, 1024, %s448_s2, %s432_s3, %s709_s21, %s709_s21, %s710_s22  }
  0xf7 PF: > { %s462_s23 = sand.u32 1, %s690_s6   ;;  %p1053_p7 = scmp.ge.s32.totalorder %s702_s9, 2 }
  0xf8   : > { %s463_s24 = scalar_lea.sflag [#allocation5], %s462_s23 }
  0xf9   : > { %p562_p5 = pnand %p1053_p7, %p775_p12 }
  0xfb   : > { %p563_p8 = pneg %p562_p5 }
  0xfd   : > { %685 = dma.done.wait (%p563_p8), %s463_s24, 1024  }
  0xfe   : > { %687 = vsyncadd (%p563_p8), %s463_s24, 4294966272  ;;  %p14_p10 = scmp.ge.s32.totalorder %s746_s12, 4   ;;  %s1054_s6 = smov %s694_s7 }
  0xff   : > { %s1055_s7 = smov %s698_s8  ;;  %s1056_s8 = smov %s758_s15 }
 0x100   : > { %s1057_s9 = smov %s746_s12  ;;  %16 = sbr.rel (!%p14_p10) target bundleno = 5 (0x5), region = 75 }
 0x105   :  { %469 = vsyncpa [#allocation4], 1 }
 0x106   :  { %471 = vsyncpa [#allocation4 + $0x1], 1 }
 0x107   :  { %472 = vsyncpa [#allocation5], 1 }
 0x108   :  { %474 = vsyncpa [#allocation5 + $0x1], 1 }

</bundles_post_ra>
